<compile_context>
chip_gen: v5e
topology: v5e:2x2
jax: 0.10.0
libtpu: 0.0.40
codegen_flags: <defaults>
</compile_context>

<pallas_src>
import functools

import jax
import jax.numpy as jnp
from jax.experimental import pallas as pl
from jax.experimental.pallas import tpu as pltpu

EPS = 1e-5


def bottleneck_kernel(L, x_ref, bn1_ref, w1_ref, b2_ref, w2_ref, out_ref):
    """One lane-dense slab: x_ref (C, Lb) -> out_ref (C+G, Lb) (x ++ new chans)."""
    C = x_ref.shape[0]
    x = x_ref[...]                                            # (C, Lb)

    # --- bn1 (pre-folded scale/shift) + relu ------------------------------
    h1 = jnp.maximum(x * bn1_ref[:, 0:1] + bn1_ref[:, 1:2], 0.0)

    # --- conv1 (1x1) with bn2 scale folded into the weight (MXU matmul) ---
    y1 = jnp.dot(w1_ref[...], h1, preferred_element_type=jnp.float32)   # (I, Lb)

    # --- bn2 shift + relu --------------------------------------------------
    h2 = jnp.maximum(y1 + b2_ref[...], 0.0)                   # (I, Lb)
    I, Lb = h2.shape

    # --- in-kernel boundary masks (no HBM mask stream) ---------------------
    # Position within each length-L batch segment of the flattened lane axis.
    # mask_l zeroes local position 0 (left zero pad of the k=3 conv and
    # cross-segment leakage of the shift); mask_r zeroes local position L-1.
    local = jax.lax.broadcasted_iota(jnp.int32, (1, Lb), 1) % L
    mask_l = (local != 0).astype(h2.dtype)
    mask_r = (local != (L - 1)).astype(h2.dtype)

    # --- conv2 (k=3, padding=1): rolls + accumulating dots ------------------
    if Lb % 128 == 0:
        # XLU lane rotation (free slot); no shifted copies via vst/vld.
        h2_prev = pltpu.roll(h2, 1, 1) * mask_l          # h2[:, j-1]
        h2_next = pltpu.roll(h2, Lb - 1, 1) * mask_r     # h2[:, j+1]
    else:
        # Lane-unaligned fallback (tiny shapes): explicit shifted copies.
        zcol = jnp.zeros((I, 1), dtype=h2.dtype)
        h2_prev = jnp.concatenate([zcol, h2[:, :Lb - 1]], axis=1) * mask_l
        h2_next = jnp.concatenate([h2[:, 1:], zcol], axis=1) * mask_r

    # Accumulating MXU dots against the per-tap weights (no (3I, Lb) stack).
    y2 = jnp.dot(w2_ref[0], h2_prev, preferred_element_type=jnp.float32)
    y2 = y2 + jnp.dot(w2_ref[1], h2, preferred_element_type=jnp.float32)
    y2 = y2 + jnp.dot(w2_ref[2], h2_next, preferred_element_type=jnp.float32)

    # --- fused pass-through concat -----------------------------------------
    out_ref[0:C, :] = x.astype(out_ref.dtype)
    out_ref[C:, :] = y2.astype(out_ref.dtype)


def _pick_batch_tile(N, L, max_lanes=32768):
    """Pick a batch tile whose lane width (bt*L) is a multiple of 128, as large
    as possible under `max_lanes`, preferring a grid of >= 2 steps (pipelining
    and both v7x TensorCores).  Falls back to the whole batch in one step
    (block == full array, which also satisfies the BlockSpec rule)."""
    best = None       # lane-aligned AND grid >= 2
    best_any = None   # lane-aligned, any grid length
    for bt in range(1, N + 1):
        if N % bt:
            continue
        lanes = bt * L
        if lanes % 128 == 0 and lanes <= max_lanes:
            best_any = bt
            if N // bt >= 2:
                best = bt
    if best is not None:
        return best
    if best_any is not None:
        return best_any
    return N


def bottleneck_forward(x, params, *, batch_tile=None):
    (g1, b1, m1, v1, w1, g2, b2, m2, v2, w2) = params
    N, C, L = x.shape
    I = w1.shape[0]          # interChannels = 4 * growthRate
    G = w2.shape[0]          # growthRate

    # ---- host-side parameter folding (done once, pure plumbing) ----------
    scale1 = g1 * jax.lax.rsqrt(v1 + EPS)
    shift1 = b1 - m1 * scale1
    bn1p = jnp.stack([scale1, shift1], axis=1)                # (C, 2)

    s2 = g2 * jax.lax.rsqrt(v2 + EPS)
    w1f = w1 * s2[:, None]                                    # BN2 scale into conv1 weight
    bias2 = (b2 - m2 * s2).reshape(I, 1)                      # (I, 1)

    # Per-tap conv2 weights: (G, I, 3) -> (3, G, I) so the kernel indexes
    # w2_ref[k] without unaligned lane slices.
    w2t = jnp.transpose(w2, (2, 0, 1))                        # (3, G, I)

    # ---- lane-dense activation layout: (N, C, L) -> (C, N*L) -------------
    xt = jnp.transpose(x, (1, 0, 2)).reshape(C, N * L)

    if batch_tile is None:
        batch_tile = _pick_batch_tile(N, L)
    Lb = batch_tile * L
    grid = (N // batch_tile,)

    # Per-step VMEM footprint (double-buffered I/O + in-kernel intermediates),
    # with headroom; capped at 64 MiB so the limit is valid on v7x too.
    bytes_per_lane = 4 * (2 * C + 2 * (C + G) + C + 3 * I + 2 * I + G + 16)
    vmem_limit = int(min(64 * 2**20,
                         max(32 * 2**20, (bytes_per_lane * Lb * 5) // 4)))

    grid_spec = pltpu.PrefetchScalarGridSpec(
        num_scalar_prefetch=0,
        grid=grid,
        in_specs=[
            pl.BlockSpec((C, Lb), lambda i: (0, i)),          # x slab
            pl.BlockSpec((C, 2), lambda i: (0, 0)),           # bn1 scale/shift
            pl.BlockSpec((I, C), lambda i: (0, 0)),           # folded conv1 weight
            pl.BlockSpec((I, 1), lambda i: (0, 0)),           # folded bn2 bias
            pl.BlockSpec((3, G, I), lambda i: (0, 0, 0)),     # per-tap conv2 weights
        ],
        out_specs=pl.BlockSpec((C + G, Lb), lambda i: (0, i)),
    )

    out_flat = pl.pallas_call(
        functools.partial(bottleneck_kernel, L),
        out_shape=jax.ShapeDtypeStruct((C + G, N * L), x.dtype),
        grid_spec=grid_spec,
        compiler_params=pltpu.CompilerParams(
            dimension_semantics=("parallel",),
            vmem_limit_bytes=vmem_limit),
    )(xt, bn1p, w1f, bias2, w2t)

    # (C+G, N*L) -> (N, C+G, L).
    return jnp.transpose(out_flat.reshape(C + G, N, L), (1, 0, 2))


def bottleneck_reference(x, params):
    """Plain-JAX reference (inference-mode BN), for correctness check."""
    (g1, b1, m1, v1, w1, g2, b2, m2, v2, w2) = params
    N, C, L = x.shape
    bn1 = (x - m1[None, :, None]) / jnp.sqrt(v1[None, :, None] + EPS) \
        * g1[None, :, None] + b1[None, :, None]
    h1 = jnp.maximum(bn1, 0.0)
    y1 = jnp.einsum('oc,ncl->nol', w1, h1)
    bn2 = (y1 - m2[None, :, None]) / jnp.sqrt(v2[None, :, None] + EPS) \
        * g2[None, :, None] + b2[None, :, None]
    h2 = jnp.maximum(bn2, 0.0)
    h2p = jnp.pad(h2, ((0, 0), (0, 0), (1, 1)))
    y2 = sum(jnp.einsum('oi,nil->nol', w2[:, :, k], h2p[:, :, k:k + L])
             for k in range(3))
    return jnp.concatenate([x, y2], axis=1)


if __name__ == "__main__":
    # Module config: nChannels=4, growthRate=4 -> interChannels=16.
    # L=64, N=4 gives a lane-aligned 128-lane tile and a 2-step grid.
    N, C, L = 4, 4, 64
    growth = 4
    inter = 4 * growth

    key = jax.random.PRNGKey(0)
    ks = jax.random.split(key, 12)

    x = jax.random.normal(ks[0], (N, C, L), dtype=jnp.float32)

    # Deterministic synthetic parameters (no checkpoint load).
    g1 = 1.0 + 0.1 * jax.random.normal(ks[1], (C,), dtype=jnp.float32)
    b1 = 0.1 * jax.random.normal(ks[2], (C,), dtype=jnp.float32)
    m1 = 0.1 * jax.random.normal(ks[3], (C,), dtype=jnp.float32)
    v1 = 1.0 + 0.1 * jnp.abs(jax.random.normal(ks[4], (C,), dtype=jnp.float32))
    w1 = 0.2 * jax.random.normal(ks[5], (inter, C), dtype=jnp.float32)      # Conv1d k=1
    g2 = 1.0 + 0.1 * jax.random.normal(ks[6], (inter,), dtype=jnp.float32)
    b2 = 0.1 * jax.random.normal(ks[7], (inter,), dtype=jnp.float32)
    m2 = 0.1 * jax.random.normal(ks[8], (inter,), dtype=jnp.float32)
    v2 = 1.0 + 0.1 * jnp.abs(jax.random.normal(ks[9], (inter,), dtype=jnp.float32))
    w2 = 0.2 * jax.random.normal(ks[10], (growth, inter, 3), dtype=jnp.float32)  # Conv1d k=3

    params = (g1, b1, m1, v1, w1, g2, b2, m2, v2, w2)

    out = bottleneck_forward(x, params)
    out = jax.block_until_ready(out)

    ref = bottleneck_reference(x, params)
    assert out.shape == (N, C + growth, L), out.shape
    assert jnp.allclose(out, ref, atol=1e-4, rtol=1e-4), \
        float(jnp.max(jnp.abs(out - ref)))

    print("KERNEL_OK")
</pallas_src>

<mosaic_0001>
module attributes {stable_mosaic.version = 11 : i64} {
  func.func @bottleneck_kernel(%arg0: i32, %arg1: memref<4x128xf32, #tpu.memory_space<vmem>>, %arg2: memref<4x2xf32, #tpu.memory_space<vmem>>, %arg3: memref<16x4xf32, #tpu.memory_space<vmem>>, %arg4: memref<16x1xf32, #tpu.memory_space<vmem>>, %arg5: memref<3x4x16xf32, #tpu.memory_space<vmem>>, %arg6: memref<8x128xf32, #tpu.memory_space<vmem>>) attributes {dimension_semantics = [#tpu.dimension_semantics<parallel>], iteration_bounds = array<i64: 2>, scalar_prefetch = 0 : i64, scratch_operands = 0 : i64, tpu.core_type = #tpu.core_type<tc>, window_params = [{transform_indices = @transform_0, window_bounds = array<i64: 4, 128>}, {pipeline_mode = #tpu.pipeline_mode<synchronous>, transform_indices = @transform_1, window_bounds = array<i64: 4, 2>}, {pipeline_mode = #tpu.pipeline_mode<synchronous>, transform_indices = @transform_2, window_bounds = array<i64: 16, 4>}, {pipeline_mode = #tpu.pipeline_mode<synchronous>, transform_indices = @transform_3, window_bounds = array<i64: 16, 1>}, {pipeline_mode = #tpu.pipeline_mode<synchronous>, transform_indices = @transform_4, window_bounds = array<i64: 3, 4, 16>}, {transform_indices = @transform_5, window_bounds = array<i64: 8, 128>}]} {
    %c0 = arith.constant 0 : index
    %c0_0 = arith.constant 0 : index
    %0 = vector.load %arg1[%c0, %c0_0] : memref<4x128xf32, #tpu.memory_space<vmem>>, vector<4x128xf32>
    %c0_1 = arith.constant 0 : index
    %c0_2 = arith.constant 0 : index
    %1 = vector.load %arg2[%c0_1, %c0_2] : memref<4x2xf32, #tpu.memory_space<vmem>>, vector<4x1xf32>
    %2 = vector.broadcast %1 : vector<4x1xf32> to vector<4x128xf32>
    %3 = arith.mulf %0, %2 : vector<4x128xf32>
    %c0_3 = arith.constant 0 : index
    %c1 = arith.constant 1 : index
    %4 = vector.load %arg2[%c0_3, %c1] : memref<4x2xf32, #tpu.memory_space<vmem>>, vector<4x1xf32>
    %5 = vector.broadcast %4 : vector<4x1xf32> to vector<4x128xf32>
    %6 = arith.addf %3, %5 : vector<4x128xf32>
    %cst = arith.constant 0.000000e+00 : f32
    %7 = vector.broadcast %cst : f32 to vector<4x128xf32>
    %8 = arith.maximumf %6, %7 : vector<4x128xf32>
    %c0_4 = arith.constant 0 : index
    %c0_5 = arith.constant 0 : index
    %9 = vector.load %arg3[%c0_4, %c0_5] : memref<16x4xf32, #tpu.memory_space<vmem>>, vector<16x4xf32>
    %cst_6 = arith.constant dense<0.000000e+00> : vector<16x128xf32>
    %10 = tpu.matmul %9, %8, %cst_6 {dimension_numbers = #tpu.dot_dimension_numbers<[1], [0], [0], [1], [0, 0, 1, 1], [], []>} : vector<16x4xf32>, vector<4x128xf32>, vector<16x128xf32> -> vector<16x128xf32>
    %c0_7 = arith.constant 0 : index
    %c0_8 = arith.constant 0 : index
    %11 = vector.load %arg4[%c0_7, %c0_8] : memref<16x1xf32, #tpu.memory_space<vmem>>, vector<16x1xf32>
    %12 = vector.broadcast %11 : vector<16x1xf32> to vector<16x128xf32>
    %13 = arith.addf %10, %12 : vector<16x128xf32>
    %cst_9 = arith.constant 0.000000e+00 : f32
    %14 = vector.broadcast %cst_9 : f32 to vector<16x128xf32>
    %15 = arith.maximumf %13, %14 : vector<16x128xf32>
    %16 = tpu.iota {dimensions = array<i32: 1>} : vector<1x128xi32>
    %c64_i32 = arith.constant 64 : i32
    %c0_i32 = arith.constant 0 : i32
    %17 = arith.cmpi eq, %c64_i32, %c0_i32 : i32
    %c1_i32 = arith.constant 1 : i32
    %18 = arith.select %17, %c1_i32, %c64_i32 : i32
    %19 = vector.broadcast %18 : i32 to vector<1x128xi32>
    %20 = arith.remsi %16, %19 : vector<1x128xi32>
    %c0_i32_10 = arith.constant 0 : i32
    %21 = vector.broadcast %c0_i32_10 : i32 to vector<1x128xi32>
    %22 = arith.cmpi ne, %20, %21 : vector<1x128xi32>
    %c0_i32_11 = arith.constant 0 : i32
    %23 = vector.broadcast %c0_i32_11 : i32 to vector<1x128xi32>
    %24 = arith.cmpi slt, %20, %23 : vector<1x128xi32>
    %c0_i32_12 = arith.constant 0 : i32
    %25 = arith.cmpi slt, %18, %c0_i32_12 : i32
    %26 = vector.broadcast %25 : i1 to vector<1x128xi1>
    %27 = vector.broadcast %26 : vector<1x128xi1> to vector<1x128xi1>
    %28 = arith.xori %24, %27 : vector<1x128xi1>
    %29 = arith.andi %28, %22 : vector<1x128xi1>
    %30 = vector.broadcast %18 : i32 to vector<1x128xi32>
    %31 = arith.addi %20, %30 : vector<1x128xi32>
    %32 = arith.select %29, %31, %20 : vector<1x128xi1>, vector<1x128xi32>
    %c0_i32_13 = arith.constant 0 : i32
    %33 = vector.broadcast %c0_i32_13 : i32 to vector<1x128xi32>
    %34 = arith.cmpi ne, %32, %33 : vector<1x128xi32>
    %35 = arith.extui %34 : vector<1x128xi1> to vector<1x128xi32>
    %36 = arith.sitofp %35 : vector<1x128xi32> to vector<1x128xf32>
    %c63_i32 = arith.constant 63 : i32
    %37 = vector.broadcast %c63_i32 : i32 to vector<1x128xi32>
    %38 = arith.cmpi ne, %32, %37 : vector<1x128xi32>
    %39 = arith.extui %38 : vector<1x128xi1> to vector<1x128xi32>
    %40 = arith.sitofp %39 : vector<1x128xi32> to vector<1x128xf32>
    %c1_i32_14 = arith.constant 1 : i32
    %41 = tpu.dynamic_rotate %15 by %c1_i32_14 dim 1 : vector<16x128xf32>, i32 -> vector<16x128xf32>
    %42 = vector.broadcast %36 : vector<1x128xf32> to vector<16x128xf32>
    %43 = arith.mulf %41, %42 : vector<16x128xf32>
    %c127_i32 = arith.constant 127 : i32
    %44 = tpu.dynamic_rotate %15 by %c127_i32 dim 1 : vector<16x128xf32>, i32 -> vector<16x128xf32>
    %45 = vector.broadcast %40 : vector<1x128xf32> to vector<16x128xf32>
    %46 = arith.mulf %44, %45 : vector<16x128xf32>
    %c0_15 = arith.constant 0 : index
    %c0_16 = arith.constant 0 : index
    %c0_17 = arith.constant 0 : index
    %47 = vector.load %arg5[%c0_15, %c0_16, %c0_17] : memref<3x4x16xf32, #tpu.memory_space<vmem>>, vector<1x4x16xf32>
    %48 = vector.shape_cast %47 : vector<1x4x16xf32> to vector<4x16xf32>
    %cst_18 = arith.constant dense<0.000000e+00> : vector<4x128xf32>
    %49 = tpu.matmul %48, %43, %cst_18 {dimension_numbers = #tpu.dot_dimension_numbers<[1], [0], [0], [1], [0, 0, 1, 1], [], []>} : vector<4x16xf32>, vector<16x128xf32>, vector<4x128xf32> -> vector<4x128xf32>
    %c1_19 = arith.constant 1 : index
    %c0_20 = arith.constant 0 : index
    %c0_21 = arith.constant 0 : index
    %50 = vector.load %arg5[%c1_19, %c0_20, %c0_21] : memref<3x4x16xf32, #tpu.memory_space<vmem>>, vector<1x4x16xf32>
    %51 = vector.shape_cast %50 : vector<1x4x16xf32> to vector<4x16xf32>
    %cst_22 = arith.constant dense<0.000000e+00> : vector<4x128xf32>
    %52 = tpu.matmul %51, %15, %cst_22 {dimension_numbers = #tpu.dot_dimension_numbers<[1], [0], [0], [1], [0, 0, 1, 1], [], []>} : vector<4x16xf32>, vector<16x128xf32>, vector<4x128xf32> -> vector<4x128xf32>
    %53 = arith.addf %49, %52 : vector<4x128xf32>
    %c2 = arith.constant 2 : index
    %c0_23 = arith.constant 0 : index
    %c0_24 = arith.constant 0 : index
    %54 = vector.load %arg5[%c2, %c0_23, %c0_24] : memref<3x4x16xf32, #tpu.memory_space<vmem>>, vector<1x4x16xf32>
    %55 = vector.shape_cast %54 : vector<1x4x16xf32> to vector<4x16xf32>
    %cst_25 = arith.constant dense<0.000000e+00> : vector<4x128xf32>
    %56 = tpu.matmul %55, %46, %cst_25 {dimension_numbers = #tpu.dot_dimension_numbers<[1], [0], [0], [1], [0, 0, 1, 1], [], []>} : vector<4x16xf32>, vector<16x128xf32>, vector<4x128xf32> -> vector<4x128xf32>
    %57 = arith.addf %53, %56 : vector<4x128xf32>
    %c0_26 = arith.constant 0 : index
    %c0_27 = arith.constant 0 : index
    %58 = vector.load %arg6[%c0_26, %c0_27] : memref<8x128xf32, #tpu.memory_space<vmem>>, vector<4x128xf32>
    tpu.vector_store %arg6[%c0_26, %c0_27], %0 {strides = array<i32>} : memref<8x128xf32, #tpu.memory_space<vmem>>, vector<4x128xf32>,
    %c4 = arith.constant 4 : index
    %c0_28 = arith.constant 0 : index
    %59 = vector.load %arg6[%c4, %c0_28] : memref<8x128xf32, #tpu.memory_space<vmem>>, vector<4x128xf32>
    tpu.vector_store %arg6[%c4, %c0_28], %57 {strides = array<i32>} : memref<8x128xf32, #tpu.memory_space<vmem>>, vector<4x128xf32>,
    return
  }
  func.func @transform_0(%arg0: i32) -> (i32, i32) {
    %c0_i32 = arith.constant 0 : i32
    %c0_i32_0 = arith.constant 0 : i32
    return %c0_i32, %arg0 : i32, i32
  }
  func.func @transform_1(%arg0: i32) -> (i32, i32) {
    %c0_i32 = arith.constant 0 : i32
    %c0_i32_0 = arith.constant 0 : i32
    %c0_i32_1 = arith.constant 0 : i32
    return %c0_i32, %c0_i32_0 : i32, i32
  }
  func.func @transform_2(%arg0: i32) -> (i32, i32) {
    %c0_i32 = arith.constant 0 : i32
    %c0_i32_0 = arith.constant 0 : i32
    %c0_i32_1 = arith.constant 0 : i32
    return %c0_i32, %c0_i32_0 : i32, i32
  }
  func.func @transform_3(%arg0: i32) -> (i32, i32) {
    %c0_i32 = arith.constant 0 : i32
    %c0_i32_0 = arith.constant 0 : i32
    %c0_i32_1 = arith.constant 0 : i32
    return %c0_i32, %c0_i32_0 : i32, i32
  }
  func.func @transform_4(%arg0: i32) -> (i32, i32, i32) {
    %c0_i32 = arith.constant 0 : i32
    %c0_i32_0 = arith.constant 0 : i32
    %c0_i32_1 = arith.constant 0 : i32
    %c0_i32_2 = arith.constant 0 : i32
    return %c0_i32, %c0_i32_0, %c0_i32_1 : i32, i32, i32
  }
  func.func @transform_5(%arg0: i32) -> (i32, i32) {
    %c0_i32 = arith.constant 0 : i32
    %c0_i32_0 = arith.constant 0 : i32
    return %c0_i32, %arg0 : i32, i32
  }
}

</mosaic_0001>

<bundles_post_ra>
// kernel: tpu_custom_call.1
= control target key start
LH: loop header
LB: loop body
LE: loop exit
PB: predicated region body
PF: predicated region fallthrough
CT: control target
= control target key end

     0   :  { %10 = vsyncpa [#allocation3], 0  ;;  %s757_s0 = inlined_call_operand.vmem [shape: f32[4,256], index: 0, kind: input, shape index: {}]   ;;  %s758_s1 = inlined_call_operand.vmem [shape: f32[4,2], index: 1, kind: input, shape index: {}]   ;;  %s759_s2 = inlined_call_operand.vmem [shape: f32[16,4], index: 2, kind: input, shape index: {}]   ;;  %s760_s3 = inlined_call_operand.vmem [shape: f32[16,1], index: 3, kind: input, shape index: {}]   ;;  %s761_s4 = inlined_call_operand.vmem [shape: f32[3,4,16], index: 4, kind: input, shape index: {}]   ;;  %s762_s5 = inlined_call_operand.hbm [shape: f32[8,256], index: 5, kind: output, shape index: {}]  }
   0x1   :  { %12 = vsyncpa [#allocation3 + $0x1], 0  ;;  %s636_s18 = smov 0   ;;  %s638_s19 = smov 0  }
   0x2   :  { %s640_s20 = smov 0   ;;  %s642_s21 = smov 0  }
   0x3 LB: > { %s657_s22 = sadd.s32 4294967295, %s599_s21   ;;  %s469_s23 = sadd.s32 4294967294, %s599_s21   ;;  %s599_s21 = sphi %s642_s21, %s768_s21   ;;  %s595_s20 = sphi %s640_s20, %s767_s20   ;;  %s591_s19 = sphi %s638_s19, %s766_s19   ;;  %s587_s18 = sphi %s636_s18, %s765_s18  }
   0x4   : > { %s661_s24 = sadd.s32 1, %s599_s21   ;;  %s135_s25 = sadd.s32 1, %s595_s20 }
   0x5   : > { %s132_s26 = ssub.s32 %s599_s21, %s661_s24  ;;  %p145_p0 = scmp.ne.s32.totalorder %s595_s20, %s591_s19 }
   0x6   : > { %p133_p1 = scmp.eq.s32.totalorder %s132_s26, 0  ;;  %p146_p2 = scmp.eq.s32.totalorder %s657_s22, 1 }
   0x7   : > { %p151_p3 = scmp.ne.s32.totalorder %s591_s19, %s587_s18  ;;  %p152_p4 = scmp.eq.s32.totalorder %s469_s23, 1 }
   0x8   : > { %s672_s27 = scalar_select %p133_p1, %s595_s20, %s135_s25  }
   0x9   : > { %p674_p5 = por %p146_p2, %p145_p0  ;;  %p678_p6 = por %p152_p4, %p151_p3 }
   0xa   : > { %p472_p7 = scmp.ge.s32.totalorder %s599_s21, 1  ;;  %p189_p8 = scmp.lt.s32.totalorder %s599_s21, 3 }
   0xc   : > { %p190_p9 = pnand %p472_p7, %p189_p8 }
   0xd   : > { %p216_p10 = scmp.lt.s32.totalorder (!%p190_p9), %s657_s22, 1  ;;  %s213_s8 = sand.u32 (!%p190_p9), 1, %s591_s19  }
   0xe   : > { %193 = sbr.rel (%p190_p9) target bundleno = 545 (0x221), region = 40  ;;  %s473_s10 = sshll.u32 (!%p190_p9), %s213_s8, 3 }
   0xf   : > { %s695_s14 = scalar_lea.vmem (!%p190_p9), [#allocation2], %s473_s10  ;;  %s486_s17 = sshll.u32 (!%p190_p9), %s657_s22, 3 }
  0x10   : > { %s405_s26 = scalar_lea.hbm (!%p190_p9), %s762_s5, %s486_s17  ;;  %s407_s30 = sshll.u32 (!%p190_p9), %s695_s14, 4  ;;  %s408_s30 = int_to_ptr.vmem [resolvable:$true] %s407_s30 }
  0x11   : > { %s409_s6 = sshll.u32 (!%p190_p9), %s405_s26, 4  ;;  %s557_s12 = scalar_lea.hbm (!%p190_p9), %s762_s5, 16  ;;  %s410_s6 = int_to_ptr.hbm [resolvable:$true] %s409_s6 }
  0x13   : > { %v221_v0 = vld [vmem:[%s758_s1] sm:$0xf]  ;;  %v601_v1 = vmov 0   ;;  %v602_v2 = vmov 1   ;;  %s217_s7 = scalar_select %p216_p10, %s657_s22, 1  ;;  %v237_v4 = vld [vmem:[%s760_s3 + $0x8] sm:$0xff]  ;;  %v284_v21 = vlaneseq }
  0x14   : > { %533 = vset.pattern.permute.xlu0 %v601_v1  ;;  %535 = vset.pattern.permute.xlu1 %v601_v1  ;;  %v236_v5 = vld [vmem:[%s760_s3] sm:$0xff]  ;;  %vm255_vm0 = vcmask 1043456   ;;  %vm248_vm1 = vcmask 31744   ;;  %v235_v12 = vld [vmem:[%s759_s2 + $0x8] sm:$0xff]  ;;  %vm319_vm3 = vcmask 130048   ;;  %v605_v26 = vmov 0.0  }
  0x15   : > { %224 = vperm.xlu0 %533, %v221_v0   ;;  %s474_s9 = sshll.u32 %s217_s7, 2  ;;  %245 = vperm.xlu1 %535, %v237_v4   ;;  %v234_v11 = vld [vmem:[%s759_s2] sm:$0xff]  ;;  %s603_s7 = smov 1   ;;  %v285_v22 = vand.u32 127, %v284_v21  ;;  %v483_v37 = vld [vmem:[%s761_s4 + $0x8] sm:$0xf] }
  0x16   : > { %s219_s13 = scalar_lea.vmem %s757_s0, %s474_s9  ;;  %s604_s9 = smov 127   ;;  %v480_v25 = vld [vmem:[%s761_s4 + $0x4] sm:$0xf]  ;;  %v316_v31 = vld [vmem:[%s761_s4] sm:$0xf] }
  0x17   : > { %v220_v3 = vld [vmem:[%s219_s13] sm:$0xf]  ;;  %v290_v24 = vand.u32 63, %v285_v22 }
  0x18   : > { %392 = vst [vmem:[%s695_s14] sm:$0xf] %v220_v3 }
  0x19   : > { %vm298_vm2 = vcmp.ne.s32.totalorder %v290_v24, 0  ;;  %vm301_vm4 = vcmp.ne.s32.totalorder %v290_v24, 63 }
  0x1a   : > { %v478_v27 = vsel %vm298_vm2, 1.0, %v605_v26  ;;  %v479_v32 = vsel %vm301_vm4, 1.0, %v605_v26 }
  0x1d   : > { %534 = vset.pattern.permute.xlu0 %v602_v2  ;;  %240 = vperm.xlu1 %535, %v236_v5  }
  0x1e   : > { %229 = vperm.xlu0 %534, %v221_v0  }
  0x26   : > { %536 = vset.pattern.permute.xlu0 %v601_v1 }
  0x87   : > { %v225_v6 = vpop.permute.xlu0 %224  ;;  %v246_v13 = vpop.permute.xlu1 %245 }
  0x88   : > { %v227_v7 = vmul.f32 %v225_v6, %v220_v3 }
  0x8f   : > { %v241_v14 = vpop.permute.xlu1 %240 }
  0x90   : > { %v230_v8 = vpop.permute.xlu0 %229 }
  0x91   : > { %v232_v9 = vadd.f32 %v230_v8, %v227_v7 }
  0x93   : > { %v233_v10 = vmax.f32 %v232_v9, 0.0 }
  0x95   : > { %475 = vmatpush.msk.msra.mxu0 %vm255_vm0, %v233_v10 }
  0x96   : > { %476 = vmatmul.msk.f32.vlgmr.msra.gmra.mxu0 %vm248_vm1, %v234_v11 }
  0x9e   : > { %477 = vmatmul.msk.f32.gmra.mxu0 %vm248_vm1, %v235_v12 }
 0x113   : > { %v276_v15 = vpop.f32.mrf.mxu0 }
 0x114   : > { %v277_v16 = vadd.f32 %v276_v15, %v241_v14 }
 0x116   : > { %v282_v17 = vmax.f32 %v277_v16, 0.0 }
 0x118   : > { %304 = vrot.lane.b32.xlu2 %v282_v17, %s603_s7 }
 0x11b   : > { %v279_v18 = vpop.f32.mrf.mxu0 }
 0x11c   : > { %v280_v19 = vadd.f32 %v279_v18, %v246_v13 }
 0x11e   : > { %v283_v20 = vmax.f32 %v280_v19, 0.0 }
 0x120   : > { %312 = vrot.lane.b32.xlu1 %v283_v20, %s604_s9  ;;  %337 = vmatpush.msra.mxu1 %v283_v20 }
 0x121   : > { %306 = vrot.lane.b32.xlu2 %v283_v20, %s603_s7  ;;  %s395_s7 = scalar_lea.sflag [#allocation3], %s213_s8 }
 0x122   : > { %338 = vmatpush.msra.mxu1 %v282_v17 }
 0x123   : > { %481 = vmatmul.msk.f32.vlgmr.msra.gmra.mxu1 %vm319_vm3, %v480_v25 }
 0x129   : > { %310 = vrot.lane.b32.xlu2 %v282_v17, %s604_s9  ;;  %s551_s9 = sshra.s32 %s410_s6, 4  ;;  %s552_s9 = int_to_ptr.hbm [resolvable:$true] %s551_s9 }
 0x12a   : > { %s553_s22 = scalar_lea.hbm %s552_s9, 8  ;;  %p558_p0 = scmp.lt.s32.totalorder %s552_s9, %s762_s5 }
 0x12b   : > { %p554_p11 = scmp.ne.s32.totalorder %s552_s9, %s553_s22  ;;  %p559_p1 = scmp.lt.s32.totalorder %s557_s12, %s553_s22 }
 0x12d   : > { %p555_p12 = pnand %p554_p11, %p674_p5  ;;  %p560_p2 = por %p559_p1, %p558_p0 }
 0x12f   : > { %p556_p13 = pneg %p555_p12 }
 0x131   : > { %p561_p3 = pnand %p560_p2, %p556_p13 }
 0x172   : > { %v305_v23 = vpop.permute.xlu2 %304 }
 0x173   : > { %v308_v30 = vmul.f32 %v478_v27, %v305_v23 }
 0x17b   : > { %v307_v28 = vpop.permute.xlu2 %306 }
 0x17c   : > { %v309_v29 = vmul.f32 %v478_v27, %v307_v28 }
 0x17e   : > { %360 = vmatpush.msra.mxu2 %v309_v29 }
 0x180   : > { %361 = vmatpush.msra.mxu2 %v308_v30 }
 0x181   : > { %482 = vmatmul.msk.f32.vlgmr.msra.gmra.mxu2 %vm319_vm3, %v316_v31 }
 0x183   : > { %v311_v33 = vpop.permute.xlu2 %310 }
 0x184   : > { %v314_v36 = vmul.f32 %v479_v32, %v311_v33 }
 0x192   : > { %v313_v34 = vpop.permute.xlu1 %312 }
 0x193   : > { %v315_v35 = vmul.f32 %v479_v32, %v313_v34 }
 0x195   : > { %385 = vmatpush.msra.mxu3 %v315_v35 }
 0x197   : > { %386 = vmatpush.msra.mxu3 %v314_v36 }
 0x198   : > { %484 = vmatmul.msk.f32.vlgmr.msra.gmra.mxu3 %vm319_vm3, %v483_v37 }
 0x1a0   : > { %v340_v38 = vpop.f32.mrf.mxu1 }
 0x204   : > { %v363_v39 = vpop.f32.mrf.mxu2 }
 0x205   : > { %v364_v40 = vadd.f32 %v363_v39, %v340_v38 }
 0x21b   : > { %v388_v41 = vpop.f32.mrf.mxu3 }
 0x21c   : > { %v391_v42 = vadd.f32 %v388_v41, %v364_v40 }
 0x21e   : > { %393 = vst [vmem:[%s695_s14 + $0x4] sm:$0xf] %v391_v42 }
 0x21f   : > { %564 = shalt.err (!%p561_p3)
}
 0x220   : > { %489 = dma.vmem_to_hbm [thread:$0]  (%p674_p5), %s408_s30, 128, %s410_s6, %s395_s7  }
 0x221 PF: > { %p495_p4 = scmp.ge.s32.totalorder %s599_s21, 2  ;;  %s421_s8 = sand.u32 1, %s587_s18  }
 0x222   : > { %s422_s14 = scalar_lea.sflag [#allocation3], %s421_s8 }
 0x223   : > { %p492_p7 = pnand %p495_p4, %p678_p6 }
 0x225   : > { %p493_p8 = pneg %p492_p7 }
 0x227   : > { %582 = dma.done.wait (%p493_p8), %s422_s14, 128  }
 0x228   : > { %584 = vsyncadd (%p493_p8), %s422_s14, 4294967168  ;;  %p15_p9 = scmp.ge.s32.totalorder %s661_s24, 4   ;;  %s765_s18 = smov %s591_s19 }
 0x229   : > { %s766_s19 = smov %s595_s20  ;;  %s767_s20 = smov %s672_s27 }
 0x22a   : > { %s768_s21 = smov %s661_s24  ;;  %17 = sbr.rel (!%p15_p9) target bundleno = 3 (0x3), region = 77 }
 0x22f   :  { %428 = vsyncpa [#allocation3], 1 }
 0x230   :  { %430 = vsyncpa [#allocation3 + $0x1], 1 }

</bundles_post_ra>
